<compile_context>
chip_gen: v6e
topology: v6e:2x2x1
jax: 0.10.0
libtpu: 0.0.40
codegen_flags: <defaults>
</compile_context>

<pallas_src>
from types import SimpleNamespace

import jax
import jax.numpy as jnp
from jax import lax
from jax.experimental import pallas as pl
from jax.experimental.pallas import tpu as pltpu


# ----------------------------------------------------------------------------
# helpers
# ----------------------------------------------------------------------------
def _round_up(x, m):
    return ((x + m - 1) // m) * m


def _pick_tile(n, requested):
    """Batch-tile size: multiple of 8, no larger than (rounded-up) n."""
    return max(8, min(_round_up(requested, 8), _round_up(n, 8)))


def _pack_partials(*vals):
    """Scatter scalar partial sums into lanes 0..k of sublane 0 of a lane-dense
    (1, 8, 128) f32 output tile (everything else zero)."""
    sub = lax.broadcasted_iota(jnp.int32, (1, 8, 128), 1)
    lane = lax.broadcasted_iota(jnp.int32, (1, 8, 128), 2)
    row0 = sub == 0
    out = jnp.zeros((1, 8, 128), jnp.float32)
    for k, v in enumerate(vals):
        out = out + jnp.where(row0 & (lane == k), v, 0.0).astype(jnp.float32)
    return out


# ----------------------------------------------------------------------------
# Main kernel: one batch tile per grid step.
# Inputs (all f32, flattened/lane-dense, rows beyond n are zero-padded):
#   x_ref   (TB, d)     centered samples x[s, j]
#   xt_ref  (TB, d*d)   x tiled d times along lanes:        lane k*d+j -> x[s, j]
#   bf_ref  (TB, d*d)   row-major flattened B:              lane k*d+j -> B[s, k, j]
#   btf_ref (TB, d*d)   row-major flattened B^T:            lane k*d+j -> B[s, j, k]
# Output: (1, 8, 128) tile, sublane 0 lanes 0..3 = [resid_ss, l1, dag, flat]
# ----------------------------------------------------------------------------
def golem_tile_kernel(x_ref, xt_ref, bf_ref, btf_ref, out_ref):
    x = x_ref[...]
    xt = xt_ref[...]
    bf = bf_ref[...]
    btf = btf_ref[...]

    tb, d = x.shape
    dd = d * d

    # 0/1 selector for segment sums over groups of d lanes: sel[c, k] = (c // d == k)
    row = lax.broadcasted_iota(jnp.int32, (dd, d), 0)
    col = lax.broadcasted_iota(jnp.int32, (dd, d), 1)
    lo = col * d
    sel = jnp.where((row >= lo) & (row < lo + d), 1.0, 0.0).astype(jnp.float32)

    # ---- likelihood residual: bx[s,k] = sum_j B[s,k,j] * x[s,j] ----
    bx = jnp.dot(bf * xt, sel, preferred_element_type=jnp.float32)   # (TB, d)
    r = x - bx
    resid_ss = jnp.sum(r * r)

    # ---- L1 penalty: sum |B| ----
    l1 = jnp.sum(jnp.abs(bf))

    # ---- DAG penalty: only the diagonal of B@B is needed:
    #      diag[s,k] = sum_j B[s,k,j] * B[s,j,k]  (elementwise exp, as torch.exp) ----
    diag = jnp.dot(bf * btf, sel, preferred_element_type=jnp.float32)  # (TB, d)
    # subtract d per tile slot; zero-padded samples contribute exp(0)*d - d = 0
    dag = jnp.sum(jnp.exp(jnp.abs(diag))) - jnp.float32(tb * d)

    # ---- flat penalty: sum (B[:, 1:, :] - B[:, :-1, :])^2  (torch slices dim 1
    #      of the (n,d,d) tensor, i.e. the row index) == lane shift by d on Bf ----
    nflat = d * (d - 1)
    diff = bf[:, d:] - bf[:, :nflat]
    flat = jnp.sum(diff * diff)

    out_ref[...] = _pack_partials(resid_ss, l1, dag, flat)


# ----------------------------------------------------------------------------
# MSE kernel for the B_label branch (dense, args.sparse == False)
# ----------------------------------------------------------------------------
def mse_tile_kernel(bf_ref, blf_ref, out_ref):
    diff = bf_ref[...] - blf_ref[...]
    sse = jnp.sum(diff * diff)
    out_ref[...] = _pack_partials(sse)


def _mse_pallas(B, B_label, tile_batch=128):
    B = B.astype(jnp.float32)
    B_label = B_label.astype(jnp.float32)
    n = B.shape[0]
    feat = 1
    for s in B.shape[1:]:
        feat *= int(s)
    Bf = B.reshape(n, feat)
    Lf = B_label.reshape(n, feat)

    tb = _pick_tile(n, tile_batch)
    n_pad = _round_up(n, tb)
    if n_pad != n:
        pad = ((0, n_pad - n), (0, 0))
        Bf = jnp.pad(Bf, pad)
        Lf = jnp.pad(Lf, pad)
    num_tiles = n_pad // tb

    partials = pl.pallas_call(
        mse_tile_kernel,
        out_shape=jax.ShapeDtypeStruct((num_tiles, 8, 128), jnp.float32),
        grid=(num_tiles,),
        in_specs=[pl.BlockSpec((tb, feat), lambda i: (i, 0)),
                  pl.BlockSpec((tb, feat), lambda i: (i, 0))],
        out_specs=pl.BlockSpec((1, 8, 128), lambda i: (i, 0, 0)),
        compiler_params=pltpu.CompilerParams(dimension_semantics=("parallel",)),
    )(Bf, Lf)
    return jnp.sum(partials) / jnp.float32(n * feat)


# ----------------------------------------------------------------------------
# Forward wrapper (mirrors golem_loss.forward for the dense / equal-variances
# configuration)
# ----------------------------------------------------------------------------
def golem_loss_forward(args, X, T, B, B_label=None, tile_batch=128):
    # T is only used by the broken 'grad' branch in the reference; unused here.
    if getattr(args, "sparse", False):
        # TODO(synk): args.sparse == True path (torch.sparse COO + pdb.set_trace)
        # is not translatable; only the dense path is implemented.
        raise NotImplementedError("sparse golem_loss is not supported")

    if B_label is not None:
        return {"total_loss": _mse_pallas(B, B_label, tile_batch)}

    n, d = X.shape
    dd = d * d
    X = X.astype(jnp.float32)
    B = B.astype(jnp.float32)

    # Pre-center X once (no per-step mean recompute inside the kernel).
    Xc = X - jnp.mean(X, axis=0, keepdims=True)

    # Lane-dense flattened layouts, prepared once in XLA.
    Bf = B.reshape(n, dd)                         # lane k*d+j -> B[s,k,j]
    Btf = jnp.swapaxes(B, 1, 2).reshape(n, dd)    # lane k*d+j -> B[s,j,k]
    Xt = jnp.tile(Xc, (1, d))                     # lane k*d+j -> Xc[s,j]

    tb = _pick_tile(n, tile_batch)
    n_pad = _round_up(n, tb)
    if n_pad != n:
        pad = ((0, n_pad - n), (0, 0))
        Xc_p = jnp.pad(Xc, pad)
        Xt_p = jnp.pad(Xt, pad)
        Bf_p = jnp.pad(Bf, pad)
        Btf_p = jnp.pad(Btf, pad)
    else:
        Xc_p, Xt_p, Bf_p, Btf_p = Xc, Xt, Bf, Btf
    num_tiles = n_pad // tb

    partials = pl.pallas_call(
        golem_tile_kernel,
        out_shape=jax.ShapeDtypeStruct((num_tiles, 8, 128), jnp.float32),
        grid=(num_tiles,),
        in_specs=[
            pl.BlockSpec((tb, d), lambda i: (i, 0)),
            pl.BlockSpec((tb, dd), lambda i: (i, 0)),
            pl.BlockSpec((tb, dd), lambda i: (i, 0)),
            pl.BlockSpec((tb, dd), lambda i: (i, 0)),
        ],
        out_specs=pl.BlockSpec((1, 8, 128), lambda i: (i, 0, 0)),
        compiler_params=pltpu.CompilerParams(
            # per-tile partials are independent -> both TensorCores usable on v7x
            dimension_semantics=("parallel",),
        ),
    )(Xc_p, Xt_p, Bf_p, Btf_p)

    sums = jnp.sum(partials, axis=(0, 1))   # (128,), lanes 0..3 hold the totals
    resid_ss = sums[0]
    l1_sum = sums[1]
    dag_sum = sums[2]
    flat_sum = sums[3]

    # TODO(synk): slogdet (LU with pivoting) has no clean Pallas equivalent;
    # computed in plain JAX on the host graph.
    eye = jnp.eye(args.d_X, dtype=jnp.float32)
    logabsdet = jnp.linalg.slogdet(eye[None, :, :] - B)[1]   # (n,)

    if not args.equal_variances:
        # TODO(synk): non-equal-variances likelihood (per-column residual
        # log-sums) not implemented.
        raise NotImplementedError("equal_variances=False is not supported")

    # torch: 0.5*d*log(||X - B@X||_F^2) is a scalar broadcast over the batch,
    # minus the per-sample slogdet; then summed / n.
    likelihood = 0.5 * args.d_X * jnp.log(resid_ss) - jnp.sum(logabsdet) / n

    losses = {}
    total_loss = jnp.float32(0.0)
    for l, w in args.loss.items():
        if l == "L1":
            losses[l] = w * l1_sum / n
            total_loss = total_loss + losses[l]
        elif l == "dag":
            losses[l] = w * dag_sum / n
            total_loss = total_loss + losses[l]
        elif l == "flat":
            losses[l] = w * flat_sum / n
            total_loss = total_loss + losses[l]
        # TODO(synk): 'grad' loss calls _compute_gradient_penalty with the wrong
        # signature over a nonexistent self.linear1 (broken in the reference); skipped.

    losses["likelihood"] = likelihood
    losses["total_loss"] = total_loss + likelihood
    return losses


# ----------------------------------------------------------------------------
# Pure-JAX reference (mirrors the torch module) for a correctness check.
# ----------------------------------------------------------------------------
def golem_loss_ref(args, X, T, B, B_label=None):
    if B_label is not None:
        return {"total_loss": jnp.mean((B - B_label) ** 2)}
    n = X.shape[0]
    d = args.d_X
    Xc = X - jnp.mean(X, axis=0, keepdims=True)
    BX = jnp.einsum("nij,nj->ni", B, Xc, precision="highest")
    resid_ss = jnp.sum(jnp.square(Xc - BX))
    logdet = jnp.linalg.slogdet(jnp.eye(d, dtype=jnp.float32)[None] - B)[1]
    likelihood = jnp.sum(0.5 * d * jnp.log(resid_ss) - logdet) / n
    losses = {}
    total = jnp.float32(0.0)
    for l, w in args.loss.items():
        if l == "L1":
            losses[l] = w * jnp.sum(jnp.abs(B)) / n
            total = total + losses[l]
        elif l == "dag":
            mm = jnp.matmul(B, B, precision="highest")
            tr = jnp.sum(jnp.exp(jnp.abs(mm)) * jnp.eye(d, dtype=jnp.float32)[None],
                         axis=(-2, -1))
            losses[l] = w * jnp.sum(tr - d) / n
            total = total + losses[l]
        elif l == "flat":
            losses[l] = w * jnp.sum(jnp.square(B[:, 1:] - B[:, :-1])) / n
            total = total + losses[l]
    losses["likelihood"] = likelihood
    losses["total_loss"] = total + likelihood
    return losses


def _close(a, b, rtol=2e-3, atol=5e-3):
    return abs(a - b) <= atol + rtol * abs(b)


if __name__ == "__main__":
    d = 16
    n = 40
    args = SimpleNamespace(
        sparse=False,
        equal_variances=True,
        d_X=d,
        loss={"L1": 0.01, "dag": 1.0, "flat": 0.1},
    )

    key = jax.random.PRNGKey(0)
    kx, kb, kl, kt = jax.random.split(key, 4)
    X = jax.random.normal(kx, (n, d), dtype=jnp.float32)
    B = 0.1 * jax.random.normal(kb, (n, d, d), dtype=jnp.float32)
    B_label = B + 0.05 * jax.random.normal(kl, (n, d, d), dtype=jnp.float32)
    T = jax.random.normal(kt, (n,), dtype=jnp.float32)  # unused by dense path

    ok = True

    # Main (no-label) branch: multi-tile with padding (40 -> 48, 3 tiles) and
    # the single-tile default path.
    ref = golem_loss_ref(args, X, T, B)
    for tbatch in (16, 128):
        losses = golem_loss_forward(args, X, T, B, tile_batch=tbatch)
        jax.block_until_ready(losses["total_loss"])
        for k in ("L1", "dag", "flat", "likelihood", "total_loss"):
            a, b = float(losses[k]), float(ref[k])
            if not _close(a, b):
                ok = False
                print(f"MISMATCH tile_batch={tbatch} {k}: kernel={a} ref={b}")

    # B_label (MSE) branch.
    losses_mse = golem_loss_forward(args, X, T, B, B_label=B_label, tile_batch=16)
    jax.block_until_ready(losses_mse["total_loss"])
    ref_mse = golem_loss_ref(args, X, T, B, B_label=B_label)
    a, b = float(losses_mse["total_loss"]), float(ref_mse["total_loss"])
    if not _close(a, b, rtol=2e-3, atol=1e-6):
        ok = False
        print(f"MISMATCH mse total_loss: kernel={a} ref={b}")

    if not ok:
        raise SystemExit("numerical mismatch vs pure-JAX reference")
    print("KERNEL_OK")
</pallas_src>

<mosaic_0001>
module attributes {stable_mosaic.version = 11 : i64} {
  func.func @golem_tile_kernel(%arg0: i32, %arg1: memref<16x16xf32, #tpu.memory_space<vmem>>, %arg2: memref<16x256xf32, #tpu.memory_space<vmem>>, %arg3: memref<16x256xf32, #tpu.memory_space<vmem>>, %arg4: memref<16x256xf32, #tpu.memory_space<vmem>>, %arg5: memref<1x8x128xf32, #tpu.memory_space<vmem>>) attributes {dimension_semantics = [#tpu.dimension_semantics<parallel>], iteration_bounds = array<i64: 3>, scalar_prefetch = 0 : i64, scratch_operands = 0 : i64, tpu.core_type = #tpu.core_type<tc>, window_params = [{transform_indices = @transform_0, window_bounds = array<i64: 16, 16>}, {transform_indices = @transform_1, window_bounds = array<i64: 16, 256>}, {transform_indices = @transform_2, window_bounds = array<i64: 16, 256>}, {transform_indices = @transform_3, window_bounds = array<i64: 16, 256>}, {transform_indices = @transform_4, window_bounds = array<i64: 1, 8, 128>}]} {
    %c0 = arith.constant 0 : index
    %c0_0 = arith.constant 0 : index
    %0 = vector.load %arg1[%c0, %c0_0] : memref<16x16xf32, #tpu.memory_space<vmem>>, vector<16x16xf32>
    %c0_1 = arith.constant 0 : index
    %c0_2 = arith.constant 0 : index
    %1 = vector.load %arg2[%c0_1, %c0_2] : memref<16x256xf32, #tpu.memory_space<vmem>>, vector<16x256xf32>
    %c0_3 = arith.constant 0 : index
    %c0_4 = arith.constant 0 : index
    %2 = vector.load %arg3[%c0_3, %c0_4] : memref<16x256xf32, #tpu.memory_space<vmem>>, vector<16x256xf32>
    %c0_5 = arith.constant 0 : index
    %c0_6 = arith.constant 0 : index
    %3 = vector.load %arg4[%c0_5, %c0_6] : memref<16x256xf32, #tpu.memory_space<vmem>>, vector<16x256xf32>
    %4 = tpu.iota {dimensions = array<i32: 0>} : vector<256x16xi32>
    %5 = tpu.iota {dimensions = array<i32: 1>} : vector<256x16xi32>
    %c16_i32 = arith.constant 16 : i32
    %6 = vector.broadcast %c16_i32 : i32 to vector<256x16xi32>
    %7 = arith.muli %5, %6 : vector<256x16xi32>
    %8 = arith.cmpi sge, %4, %7 : vector<256x16xi32>
    %c16_i32_7 = arith.constant 16 : i32
    %9 = vector.broadcast %c16_i32_7 : i32 to vector<256x16xi32>
    %10 = arith.addi %7, %9 : vector<256x16xi32>
    %11 = arith.cmpi slt, %4, %10 : vector<256x16xi32>
    %12 = arith.andi %8, %11 : vector<256x16xi1>
    %cst = arith.constant 1.000000e+00 : f32
    %cst_8 = arith.constant 0.000000e+00 : f32
    %13 = vector.broadcast %cst : f32 to vector<256x16xf32>
    %14 = vector.broadcast %cst_8 : f32 to vector<256x16xf32>
    %15 = arith.select %12, %13, %14 : vector<256x16xi1>, vector<256x16xf32>
    %16 = arith.mulf %2, %1 : vector<16x256xf32>
    %cst_9 = arith.constant dense<0.000000e+00> : vector<16x16xf32>
    %17 = tpu.matmul %16, %15, %cst_9 {dimension_numbers = #tpu.dot_dimension_numbers<[1], [0], [0], [1], [0, 0, 1, 1], [], []>} : vector<16x256xf32>, vector<256x16xf32>, vector<16x16xf32> -> vector<16x16xf32>
    %18 = arith.subf %0, %17 : vector<16x16xf32>
    %19 = arith.mulf %18, %18 : vector<16x16xf32>
    %20 = vector.shape_cast %19 : vector<16x16xf32> to vector<1x16x16xf32>
    %cst_10 = arith.constant dense<0.000000e+00> : vector<1xf32>
    %21 = vector.multi_reduction <add>, %20, %cst_10 [1, 2] : vector<1x16x16xf32> to vector<1xf32>
    %22 = vector.shape_cast %21 : vector<1xf32> to vector<1x1x1xf32>
    %23 = vector.extract %22[0, 0, 0] : f32 from vector<1x1x1xf32>
    %24 = math.absf %2 : vector<16x256xf32>
    %25 = vector.shape_cast %24 : vector<16x256xf32> to vector<1x16x256xf32>
    %cst_11 = arith.constant dense<0.000000e+00> : vector<1xf32>
    %26 = vector.multi_reduction <add>, %25, %cst_11 [1, 2] : vector<1x16x256xf32> to vector<1xf32>
    %27 = vector.shape_cast %26 : vector<1xf32> to vector<1x1x1xf32>
    %28 = vector.extract %27[0, 0, 0] : f32 from vector<1x1x1xf32>
    %29 = arith.mulf %2, %3 : vector<16x256xf32>
    %cst_12 = arith.constant dense<0.000000e+00> : vector<16x16xf32>
    %30 = tpu.matmul %29, %15, %cst_12 {dimension_numbers = #tpu.dot_dimension_numbers<[1], [0], [0], [1], [0, 0, 1, 1], [], []>} : vector<16x256xf32>, vector<256x16xf32>, vector<16x16xf32> -> vector<16x16xf32>
    %31 = math.absf %30 : vector<16x16xf32>
    %32 = math.exp %31 : vector<16x16xf32>
    %33 = vector.shape_cast %32 : vector<16x16xf32> to vector<1x16x16xf32>
    %cst_13 = arith.constant dense<0.000000e+00> : vector<1xf32>
    %34 = vector.multi_reduction <add>, %33, %cst_13 [1, 2] : vector<1x16x16xf32> to vector<1xf32>
    %35 = vector.shape_cast %34 : vector<1xf32> to vector<1x1x1xf32>
    %36 = vector.extract %35[0, 0, 0] : f32 from vector<1x1x1xf32>
    %cst_14 = arith.constant 2.560000e+02 : f32
    %37 = arith.subf %36, %cst_14 : f32
    %38 = vector.extract_strided_slice %2 {offsets = [0, 16], sizes = [16, 240], strides = [1, 1]} : vector<16x256xf32> to vector<16x240xf32>
    %39 = vector.extract_strided_slice %2 {offsets = [0, 0], sizes = [16, 240], strides = [1, 1]} : vector<16x256xf32> to vector<16x240xf32>
    %40 = arith.subf %38, %39 : vector<16x240xf32>
    %41 = arith.mulf %40, %40 : vector<16x240xf32>
    %42 = vector.shape_cast %41 : vector<16x240xf32> to vector<1x16x240xf32>
    %cst_15 = arith.constant dense<0.000000e+00> : vector<1xf32>
    %43 = vector.multi_reduction <add>, %42, %cst_15 [1, 2] : vector<1x16x240xf32> to vector<1xf32>
    %44 = vector.shape_cast %43 : vector<1xf32> to vector<1x1x1xf32>
    %45 = vector.extract %44[0, 0, 0] : f32 from vector<1x1x1xf32>
    %46 = tpu.iota {dimensions = array<i32: 1>} : vector<1x8x128xi32>
    %47 = tpu.iota {dimensions = array<i32: 2>} : vector<1x8x128xi32>
    %c0_i32 = arith.constant 0 : i32
    %48 = vector.broadcast %c0_i32 : i32 to vector<1x8x128xi32>
    %49 = arith.cmpi eq, %46, %48 : vector<1x8x128xi32>
    %cst_16 = arith.constant 0.000000e+00 : f32
    %50 = vector.broadcast %cst_16 : f32 to vector<1x8x128xf32>
    %c0_i32_17 = arith.constant 0 : i32
    %51 = vector.broadcast %c0_i32_17 : i32 to vector<1x8x128xi32>
    %52 = arith.cmpi eq, %47, %51 : vector<1x8x128xi32>
    %53 = arith.andi %49, %52 : vector<1x8x128xi1>
    %cst_18 = arith.constant 0.000000e+00 : f32
    %54 = vector.broadcast %23 : f32 to vector<1x8x128xf32>
    %55 = vector.broadcast %cst_18 : f32 to vector<1x8x128xf32>
    %56 = arith.select %53, %54, %55 : vector<1x8x128xi1>, vector<1x8x128xf32>
    %57 = arith.addf %50, %56 : vector<1x8x128xf32>
    %c1_i32 = arith.constant 1 : i32
    %58 = vector.broadcast %c1_i32 : i32 to vector<1x8x128xi32>
    %59 = arith.cmpi eq, %47, %58 : vector<1x8x128xi32>
    %60 = arith.andi %49, %59 : vector<1x8x128xi1>
    %cst_19 = arith.constant 0.000000e+00 : f32
    %61 = vector.broadcast %28 : f32 to vector<1x8x128xf32>
    %62 = vector.broadcast %cst_19 : f32 to vector<1x8x128xf32>
    %63 = arith.select %60, %61, %62 : vector<1x8x128xi1>, vector<1x8x128xf32>
    %64 = arith.addf %57, %63 : vector<1x8x128xf32>
    %c2_i32 = arith.constant 2 : i32
    %65 = vector.broadcast %c2_i32 : i32 to vector<1x8x128xi32>
    %66 = arith.cmpi eq, %47, %65 : vector<1x8x128xi32>
    %67 = arith.andi %49, %66 : vector<1x8x128xi1>
    %cst_20 = arith.constant 0.000000e+00 : f32
    %68 = vector.broadcast %37 : f32 to vector<1x8x128xf32>
    %69 = vector.broadcast %cst_20 : f32 to vector<1x8x128xf32>
    %70 = arith.select %67, %68, %69 : vector<1x8x128xi1>, vector<1x8x128xf32>
    %71 = arith.addf %64, %70 : vector<1x8x128xf32>
    %c3_i32 = arith.constant 3 : i32
    %72 = vector.broadcast %c3_i32 : i32 to vector<1x8x128xi32>
    %73 = arith.cmpi eq, %47, %72 : vector<1x8x128xi32>
    %74 = arith.andi %49, %73 : vector<1x8x128xi1>
    %cst_21 = arith.constant 0.000000e+00 : f32
    %75 = vector.broadcast %45 : f32 to vector<1x8x128xf32>
    %76 = vector.broadcast %cst_21 : f32 to vector<1x8x128xf32>
    %77 = arith.select %74, %75, %76 : vector<1x8x128xi1>, vector<1x8x128xf32>
    %78 = arith.addf %71, %77 : vector<1x8x128xf32>
    %c0_22 = arith.constant 0 : index
    %c0_23 = arith.constant 0 : index
    %c0_24 = arith.constant 0 : index
    %79 = vector.load %arg5[%c0_22, %c0_23, %c0_24] : memref<1x8x128xf32, #tpu.memory_space<vmem>>, vector<1x8x128xf32>
    tpu.vector_store %arg5[%c0_22, %c0_23, %c0_24], %78 {strides = array<i32>} : memref<1x8x128xf32, #tpu.memory_space<vmem>>, vector<1x8x128xf32>,
    return
  }
  func.func @transform_0(%arg0: i32) -> (i32, i32) {
    %c0_i32 = arith.constant 0 : i32
    %c0_i32_0 = arith.constant 0 : i32
    return %arg0, %c0_i32 : i32, i32
  }
  func.func @transform_1(%arg0: i32) -> (i32, i32) {
    %c0_i32 = arith.constant 0 : i32
    %c0_i32_0 = arith.constant 0 : i32
    return %arg0, %c0_i32 : i32, i32
  }
  func.func @transform_2(%arg0: i32) -> (i32, i32) {
    %c0_i32 = arith.constant 0 : i32
    %c0_i32_0 = arith.constant 0 : i32
    return %arg0, %c0_i32 : i32, i32
  }
  func.func @transform_3(%arg0: i32) -> (i32, i32) {
    %c0_i32 = arith.constant 0 : i32
    %c0_i32_0 = arith.constant 0 : i32
    return %arg0, %c0_i32 : i32, i32
  }
  func.func @transform_4(%arg0: i32) -> (i32, i32, i32) {
    %c0_i32 = arith.constant 0 : i32
    %c0_i32_0 = arith.constant 0 : i32
    %c0_i32_1 = arith.constant 0 : i32
    return %arg0, %c0_i32, %c0_i32_0 : i32, i32, i32
  }
}

</mosaic_0001>

<bundles_post_ra>
// kernel: tpu_custom_call.1
= control target key start
LH: loop header
LB: loop body
LE: loop exit
PB: predicated region body
PF: predicated region fallthrough
CT: control target
= control target key end

     0   :  { %s1954_s0 = inlined_call_operand.vmem [shape: f32[48,16], index: 0, kind: input, shape index: {}]   ;;  %s1955_s1 = inlined_call_operand.hbm [shape: f32[48,256], index: 1, kind: input, shape index: {}]   ;;  %s1956_s2 = inlined_call_operand.hbm [shape: f32[48,256], index: 2, kind: input, shape index: {}]   ;;  %s1957_s3 = inlined_call_operand.hbm [shape: f32[48,256], index: 3, kind: input, shape index: {}]   ;;  %s1958_s4 = inlined_call_operand.hbm [shape: f32[3,8,128], index: 4, kind: output, shape index: {}]  }
   0x1   :  { %1965 = sst [smem:[#allocation13_spill]] %s1955_s1 }
   0x2   :  { %1966 = sst [smem:[#allocation14_spill]] %s1956_s2 }
   0x3   :  { %9 = vsyncpa [#allocation3], 0 }
   0x4   :  { %11 = vsyncpa [#allocation3 + $0x1], 0 }
   0x5   :  { %12 = vsyncpa [#allocation6], 0 }
   0x6   :  { %14 = vsyncpa [#allocation6 + $0x1], 0 }
   0x7   :  { %15 = vsyncpa [#allocation4], 0 }
   0x8   :  { %17 = vsyncpa [#allocation4 + $0x1], 0  ;;  %s1364_s15 = smov 0   ;;  %s1366_s16 = smov 0  }
   0x9   :  { %s1368_s17 = smov 0   ;;  %s1370_s18 = smov 0  }
   0xa LB: > { %s1385_s19 = sadd.s32 4294967295, %s1328_s18   ;;  %s930_s20 = sadd.s32 4294967294, %s1328_s18   ;;  %s1328_s18 = sphi %s1370_s18, %s1987_s18   ;;  %s1324_s17 = sphi %s1368_s17, %s1986_s17   ;;  %s1320_s16 = sphi %s1366_s16, %s1985_s16   ;;  %s1316_s15 = sphi %s1364_s15, %s1984_s15  }
   0xb   : > { %s1389_s21 = sadd.s32 1, %s1328_s18   ;;  %s56_s22 = sadd.s32 1, %s1324_s17 }
   0xc   : > { %s53_s23 = ssub.s32 %s1328_s18, %s1389_s21  ;;  %p63_p0 = scmp.ne.s32.totalorder %s1324_s17, %s1320_s16 }
   0xd   : > { %p54_p1 = scmp.eq.s32.totalorder %s53_s23, 0  ;;  %p64_p2 = scmp.eq.s32.totalorder %s1328_s18, 0 }
   0xe   : > { %p69_p3 = scmp.ne.s32.totalorder %s1320_s16, %s1316_s15  ;;  %p70_p4 = scmp.eq.s32.totalorder %s1385_s19, 0 }
   0xf   : > { %s1401_s24 = scalar_select %p54_p1, %s1324_s17, %s56_s22  }
  0x10   : > { %p65_p5 = por %p64_p2, %p63_p0  ;;  %p1403_p6 = por %p70_p4, %p69_p3 }
  0x11   : > { %1967 = sst [smem:[#allocation12_spill]] %s1401_s24  ;;  %p145_p7 = scmp.eq.s32.totalorder %s1385_s19, 2 }
  0x12   : > { %s1968_s25 = scalar_select %p1403_p6, 1, 0 }
  0x13   : > { %p151_p8 = scmp.eq.s32.totalorder %s930_s20, 2  ;;  %p1133_p9 = scmp.lt.s32.totalorder %s1328_s18, 3 }
  0x14   : > { %p1409_p10 = por %p145_p7, %p63_p0  ;;  %s180_s28 = sand.u32 1, %s1324_s17  }
  0x15   : > { %p1413_p11 = por %p151_p8, %p69_p3  ;;  %s1419_s29 = sshll.u32 %s1328_s18, 9 }
  0x16   : > { %s1969_s26 = scalar_select %p1409_p10, 1, 0 }
  0x17   : > { %s1970_s27 = scalar_select %p1413_p11, 1, 0 }
  0x18   : > { %s1423_s30 = sshll.u32 %s180_s28, 5  ;;  %p1425_p12 = pnand %p1133_p9, %p65_p5 }
  0x19   : > { %s202_s6 = sand.u32 1, %s1328_s18   ;;  %s1972_s2 = sld [smem:[#allocation14_spill]] }
  0x1a   : > { %s206_s10 = scalar_lea.vmem [#allocation5], %s1423_s30  ;;  %s1440_s12 = scalar_lea.sflag [#allocation6], %s202_s6 }
  0x1b   : > { %s214_s11 = sshll.u32 %s206_s10, 4  ;;  %p1446_p1 = pneg %p1425_p12  ;;  %s1437_s11 = int_to_ptr.vmem [resolvable:$true] %s214_s11 }
  0x1f   : > { %s1434_s9 = scalar_lea.hbm %s1972_s2, %s1419_s29  ;;  %s1181_s23 = scalar_lea.hbm %s1972_s2, 1536 }
  0x20   : > { %s1176_s13 = scalar_lea.hbm %s1434_s9, 512  ;;  %p1182_p4 = scmp.lt.s32.totalorder %s1434_s9, %s1972_s2 }
  0x21   : > { %p1177_p0 = scmp.ne.s32.totalorder %s1434_s9, %s1176_s13  ;;  %p1183_p5 = scmp.lt.s32.totalorder %s1181_s23, %s1176_s13 }
  0x23   : > { %p1179_p2 = pnand %p1446_p1, %p1177_p0  ;;  %p1184_p7 = por %p1183_p5, %p1182_p4 }
  0x25   : > { %p1180_p3 = pneg %p1179_p2 }
  0x27   : > { %p1185_p8 = pnand %p1184_p7, %p1180_p3 }
  0x29   : > { %1188 = shalt.err (!%p1185_p8)
}
  0x2a   : > { %s1189_s6 = scalar_lea.vmem %s1437_s11, 512  ;;  %s1330_s10 = smov [#allocation5]  }
  0x2b   : > { %p1190_p9 = scmp.ne.s32.totalorder %s1437_s11, %s1189_s6  ;;  %s1194_s20 = sshll.u32 %s1330_s10, 4  ;;  %s1195_s20 = int_to_ptr.vmem [resolvable:$false] %s1194_s20 }
  0x2c   : > { %s1196_s22 = scalar_lea.vmem %s1195_s20, 1024  ;;  %p1197_p13 = scmp.lt.s32.totalorder %s1437_s11, %s1195_s20 }
  0x2d   : > { %p1192_p0 = pnand %p1190_p9, %p1446_p1  ;;  %p1198_p11 = scmp.lt.s32.totalorder %s1196_s22, %s1189_s6 }
  0x2f   : > { %p1193_p2 = pneg %p1192_p0  ;;  %p1199_p10 = por %p1198_p11, %p1197_p13 }
  0x31   : > { %p1200_p6 = pnand %p1199_p10, %p1193_p2 }
  0x33   : > { %1203 = shalt.err (!%p1200_p6)
}
  0x34   : > { %s1961_s13 = smov 256   ;;  %s1963_s23 = smov 16  }
  0x35   : > { %1125 = dma.hbm_to_vmem [thread:$0]  (!%p1425_p12), %s1434_s9, 512, %s1437_s11, %s1440_s12, %s1961_s13, %s1961_s13, %s1963_s23  }
  0x36   : > { %p244_p11 = scmp.lt.s32.totalorder %s1328_s18, 4  ;;  %s1974_s1 = sld [smem:[#allocation13_spill]] }
  0x37   : > { %p1975_p6 = scmp.ge.s32.totalorder %s1328_s18, 1  ;;  %s184_s20 = scalar_lea.vmem [#allocation2], %s1423_s30 }
  0x38   : > { %s192_s22 = sshll.u32 %s184_s20, 4  ;;  %s181_s9 = scalar_lea.sflag [#allocation3], %s180_s28  ;;  %s1486_s22 = int_to_ptr.vmem [resolvable:$true] %s192_s22 }
  0x39   : > { %p1481_p10 = pnand %p1975_p6, %p244_p11 }
  0x3b   : > { %s1976_s10 = scalar_select %p1481_p10, 1, 0 }
  0x3c   : > { %s1477_s6 = scalar_lea.hbm %s1974_s1, %s1419_s29  ;;  %s1209_s13 = scalar_lea.hbm %s1974_s1, 1536 }
  0x3d   : > { %s1204_s11 = scalar_lea.hbm %s1477_s6, 512  ;;  %p1210_p5 = scmp.lt.s32.totalorder %s1477_s6, %s1974_s1 }
  0x3e   : > { %p1205_p13 = scmp.ne.s32.totalorder %s1477_s6, %s1204_s11  ;;  %p1211_p7 = scmp.lt.s32.totalorder %s1209_s13, %s1204_s11 }
  0x40   : > { %p1207_p3 = pnand %p1205_p13, %p1446_p1  ;;  %p1212_p8 = por %p1211_p7, %p1210_p5 }
  0x42   : > { %p1208_p4 = pneg %p1207_p3 }
  0x44   : > { %p1213_p9 = pnand %p1212_p8, %p1208_p4 }
  0x46   : > { %1216 = shalt.err (!%p1213_p9)
}
  0x47   : > { %s1217_s28 = scalar_lea.vmem %s1486_s22, 512  ;;  %s1333_s20 = smov [#allocation2]  }
  0x48   : > { %p1218_p0 = scmp.ne.s32.totalorder %s1486_s22, %s1217_s28  ;;  %s1222_s7 = sshll.u32 %s1333_s20, 4  ;;  %s1223_s7 = int_to_ptr.vmem [resolvable:$false] %s1222_s7 }
  0x49   : > { %s1224_s8 = scalar_lea.vmem %s1223_s7, 1024  ;;  %p1225_p6 = scmp.lt.s32.totalorder %s1486_s22, %s1223_s7 }
  0x4a   : > { %p1220_p2 = pnand %p1218_p0, %p1446_p1  ;;  %p1226_p13 = scmp.lt.s32.totalorder %s1224_s8, %s1217_s28 }
  0x4c   : > { %p1221_p11 = pneg %p1220_p2  ;;  %p1227_p3 = por %p1226_p13, %p1225_p6 }
  0x4e   : > { %p1228_p10 = pnand %p1227_p3, %p1221_p11 }
  0x50   : > { %1231 = shalt.err (!%p1228_p10)
}
  0x51   : > { %s1977_s2 = smov 16   ;;  %s1978_s13 = smov 256  }
  0x52   : > { %1122 = dma.hbm_to_vmem [thread:$0]  (!%p1425_p12), %s1477_s6, 512, %s1486_s22, %s181_s9, %s1978_s13, %s1978_s13, %s1977_s2  }
  0x53   : > { %s1517_s20 = scalar_lea.hbm %s1957_s3, %s1419_s29  ;;  %s228_s28 = scalar_lea.vmem [#allocation7], %s1423_s30 }
  0x54   : > { %s236_s7 = sshll.u32 %s228_s28, 4  ;;  %s1232_s8 = scalar_lea.hbm %s1517_s20, 512  ;;  %s237_s7 = int_to_ptr.vmem [resolvable:$true] %s236_s7 }
  0x55   : > { %p1233_p10 = scmp.ne.s32.totalorder %s1517_s20, %s1232_s8  ;;  %s1237_s6 = scalar_lea.hbm %s1957_s3, 1536 }
  0x56   : > { %p1238_p7 = scmp.lt.s32.totalorder %s1517_s20, %s1957_s3  ;;  %p1239_p8 = scmp.lt.s32.totalorder %s1237_s6, %s1232_s8 }
  0x57   : > { %p1235_p4 = pnand %p1233_p10, %p1446_p1 }
  0x58   : > { %p1240_p9 = por %p1239_p8, %p1238_p7 }
  0x59   : > { %p1236_p5 = pneg %p1235_p4 }
  0x5b   : > { %p1241_p0 = pnand %p1240_p9, %p1236_p5 }
  0x5d   : > { %1244 = shalt.err (!%p1241_p0)
}
  0x5e   : > { %s1245_s29 = scalar_lea.vmem %s237_s7, 512  ;;  %s1334_s30 = smov [#allocation7]  }
  0x5f   : > { %p1246_p2 = scmp.ne.s32.totalorder %s237_s7, %s1245_s29  ;;  %s1250_s23 = sshll.u32 %s1334_s30, 4  ;;  %s1251_s23 = int_to_ptr.vmem [resolvable:$false] %s1250_s23 }
  0x60   : > { %s1252_s11 = scalar_lea.vmem %s1251_s23, 1024  ;;  %p1253_p13 = scmp.lt.s32.totalorder %s237_s7, %s1251_s23 }
  0x61   : > { %p1248_p11 = pnand %p1246_p2, %p1446_p1  ;;  %p1254_p3 = scmp.lt.s32.totalorder %s1252_s11, %s1245_s29 }
  0x63   : > { %p1249_p6 = pneg %p1248_p11  ;;  %p1255_p10 = por %p1254_p3, %p1253_p13 }
  0x65   : > { %p1256_p4 = pnand %p1255_p10, %p1249_p6 }
  0x67   : > { %1259 = shalt.err (!%p1256_p4)
}
  0x68   : > { %1128 = dma.hbm_to_vmem [thread:$0]  (!%p1425_p12), %s1517_s20, 512, %s237_s7, %s1440_s12, %s1978_s13, %s1978_s13, %s1977_s2  }
  0x69   : > { %p1979_p1 = scmp.ne.s32.totalorder %s1976_s10, 0 }
  0x6a   : > { %s1543_s1 = sand.u32 (!%p1979_p1), 1, %s1320_s16   ;;  %p1980_p5 = scmp.ne.s32.totalorder (!%p1979_p1), %s1968_s25, 0 }
  0x6b   : > { %248 = sbr.rel (%p1979_p1) target bundleno = 602 (0x25a), region = 36  ;;  %s1546_s24 = sshll.u32 (!%p1979_p1), %s1543_s1, 5 }
  0x6c   : > { %s251_s14 = scalar_lea.sflag (!%p1979_p1), [#allocation3], %s1543_s1  ;;  %s1550_s5 = scalar_lea.vmem (!%p1979_p1), [#allocation2], %s1546_s24 }
  0x70   : > { %1303 = dma.done.wait (%p1980_p5), %s251_s14, 512  }
  0x71   : > { %1305 = vsyncadd (%p1980_p5), %s251_s14, 4294966784  ;;  %s259_s12 = sand.u32 1, %s1385_s19   ;;  %s1558_s2 = scalar_lea.vmem [#allocation5], %s1546_s24 }
  0x72   : > { %s260_s10 = scalar_lea.sflag [#allocation6], %s259_s12 }
  0x73   : > { %1307 = dma.done.wait (%p1980_p5), %s260_s10, 1024  }
  0x74   : > { %1309 = vsyncadd (%p1980_p5), %s260_s10, 4294966272  ;;  %v335_v0 = vlaneseq  ;;  %v1582_v10 = vld [vmem:[%s1558_s2] sm:$0xff]  ;;  %v1587_v13 = vld [vmem:[%s1558_s2 + $0x10] sm:$0xff]  ;;  %s1335_s25 = smov 16   ;;  %v1336_v15 = vmov 1.0   ;;  %s272_s13 = scalar_lea.vmem [#allocation7], %s1546_s24 }
  0x75   : > { %714 = vrot.lane.b32.xlu0 %v1582_v10, %s1335_s25  ;;  %718 = vrot.lane.b32.xlu1 %v1587_v13, %s1335_s25  ;;  %v1650_v21 = vld [vmem:[%s1558_s2 + $0x8] sm:$0xff]  ;;  %v1690_v26 = vld [vmem:[%s1558_s2 + $0x18] sm:$0xff]  ;;  %s1337_s20 = smov 112   ;;  %s950_s28 = sshll.u32 %s1385_s19, 1 }
  0x76   : > { %v1564_v1 = vshrl.u32 %v335_v0, 7  ;;  %v1566_v2 = vand.u32 127, %v335_v0  ;;  %v324_v41 = vld [vmem:[%s1550_s5 + $0x8] sm:$0xff]  ;;  %v323_v43 = vld [vmem:[%s1550_s5] sm:$0xff]  ;;  %v326_v46 = vld [vmem:[%s1550_s5 + $0x18] sm:$0xff]  ;;  %p313_p12 = scmp.lt.s32.totalorder %s950_s28, 5 }
  0x77   : > { %v332_v42 = vld [vmem:[%s272_s13 + $0x8] sm:$0xff]  ;;  %v331_v44 = vld [vmem:[%s272_s13] sm:$0xff]  ;;  %v501_v45 = vmul.f32 %v1650_v21, %v324_v41  ;;  %v334_v47 = vld [vmem:[%s272_s13 + $0x18] sm:$0xff]  ;;  %v500_v49 = vmul.f32 %v1582_v10, %v323_v43  ;;  %v503_v51 = vmul.f32 %v1690_v26, %v326_v46  ;;  %s949_s30 = sshll.u32 %s1543_s1, 3  ;;  %s1018_s24 = sshll.u32 %s1385_s19, 7 }
  0x78   : > { %v367_v3 = vadd.s32 248, %v1564_v1  ;;  %v1570_v4 = vmul.u32 16, %v1566_v2  ;;  %v351_v5 = vadd.s32 120, %v1564_v1  ;;  %v366_v6 = vadd.s32 240, %v1564_v1  ;;  %v325_v53 = vld [vmem:[%s1550_s5 + $0x10] sm:$0xff]  ;;  %s1989_s28 = smov (!%p313_p12, %s950_s28), 5 }
  0x79   : > { %v350_v7 = vadd.s32 112, %v1564_v1  ;;  %v365_v9 = vadd.s32 232, %v1564_v1  ;;  %v349_v11 = vadd.s32 104, %v1564_v1  ;;  %v364_v12 = vadd.s32 224, %v1564_v1  ;;  %716 = vrot.lane.b32.xlu0 %v1650_v21, %s1335_s25  ;;  %720 = vrot.lane.b32.xlu1 %v1690_v26, %s1335_s25  ;;  %v333_v54 = vld [vmem:[%s272_s13 + $0x10] sm:$0xff]  ;;  %s951_s7 = sshll.u32 %s1989_s28, 3  ;;  %s803_s25 = scalar_lea.hbm %s1958_s4, %s1018_s24 }
  0x7a   : > { %vm402_vm0 = vcmp.ge.s32.totalorder %v367_v3, %v1570_v4  ;;  %v1577_v8 = vadd.s32 16, %v1570_v4  ;;  %vm386_vm1 = vcmp.ge.s32.totalorder %v351_v5, %v1570_v4  ;;  %vm401_vm4 = vcmp.ge.s32.totalorder %v366_v6, %v1570_v4  ;;  %568 = vmatprep.mubr.f32.mxu0 %v501_v45  ;;  %s316_s22 = scalar_lea.vmem %s1954_s0, %s951_s7  ;;  %s311_s5 = scalar_lea.vmem [#allocation8], %s949_s30 }
  0x7b   : > { %vm385_vm7 = vcmp.ge.s32.totalorder %v350_v7, %v1570_v4  ;;  %v348_v14 = vadd.s32 96, %v1564_v1  ;;  %vm400_vm10 = vcmp.ge.s32.totalorder %v365_v9, %v1570_v4  ;;  %v363_v16 = vadd.s32 216, %v1564_v1  ;;  %s805_s12 = sshll.u32 %s311_s5, 4  ;;  %s792_s13 = scalar_lea.sflag [#allocation4], %s1543_s1  ;;  %s806_s12 = int_to_ptr.vmem [resolvable:$true] %s805_s12 }
  0x7c   : > { %vm435_vm2 = vcmp.lt.s32.totalorder %v367_v3, %v1577_v8  ;;  %vm419_vm3 = vcmp.lt.s32.totalorder %v351_v5, %v1577_v8  ;;  %vm434_vm5 = vcmp.lt.s32.totalorder %v366_v6, %v1577_v8  ;;  %vm418_vm8 = vcmp.lt.s32.totalorder %v350_v7, %v1577_v8  ;;  %p1981_p8 = scmp.ne.s32.totalorder %s1969_s26, 0  ;;  %s1338_s19 = smov [#allocation8]  }
  0x7d   : > { %vm467_vm6 = vmand %vm402_vm0, %vm435_vm2  ;;  %vm433_vm11 = vcmp.lt.s32.totalorder %v365_v9, %v1577_v8  ;;  %vm384_vm13 = vcmp.ge.s32.totalorder %v349_v11, %v1570_v4  ;;  %vm417_vm14 = vcmp.lt.s32.totalorder %v349_v11, %v1577_v8  ;;  %v347_v17 = vadd.s32 88, %v1564_v1  ;;  %s1264_s28 = sshll.u32 %s1338_s19, 4  ;;  %s1265_s28 = int_to_ptr.vmem [resolvable:$false] %s1264_s28 }
  0x7e   : > { %1027 = vmatprep.subr.msk.mxu0 %vm467_vm6, %v1336_v15  ;;  %1065 = vmatprep.subr.msk.mxu1 %vm467_vm6, %v1336_v15  ;;  %vm451_vm9 = vmand %vm386_vm1, %vm419_vm3  ;;  %vm399_vm0 = vcmp.ge.s32.totalorder %v364_v12, %v1570_v4  ;;  %vm432_vm1 = vcmp.lt.s32.totalorder %v364_v12, %v1577_v8  ;;  %v362_v18 = vadd.s32 208, %v1564_v1  ;;  %vm383_vm3 = vcmp.ge.s32.totalorder %v348_v14, %v1570_v4  ;;  %s1266_s7 = scalar_lea.vmem %s1265_s28, 256  ;;  %p1267_p2 = scmp.lt.s32.totalorder %s806_s12, %s1265_s28 }
  0x7f   : > { %1028 = vmatpush3.msk.msra.mxu0 %vm451_vm9, %v1336_v15  ;;  %1066 = vmatpush3.msk.msra.mxu1 %vm451_vm9, %v1336_v15  ;;  %vm466_vm12 = vmand %vm401_vm4, %vm434_vm5  ;;  %vm416_vm4 = vcmp.lt.s32.totalorder %v348_v14, %v1577_v8  ;;  %v346_v19 = vadd.s32 80, %v1564_v1  ;;  %vm398_vm6 = vcmp.ge.s32.totalorder %v363_v16, %v1570_v4  ;;  %v361_v20 = vadd.s32 200, %v1564_v1 }
  0x80   : > { %1029 = vmatprep.subr.msk.mxu0 %vm466_vm12, %v1336_v15  ;;  %1067 = vmatprep.subr.msk.mxu1 %vm466_vm12, %v1336_v15  ;;  %vm450_vm15 = vmand %vm385_vm7, %vm418_vm8  ;;  %vm431_vm7 = vcmp.lt.s32.totalorder %v363_v16, %v1577_v8  ;;  %vm382_vm9 = vcmp.ge.s32.totalorder %v347_v17, %v1570_v4  ;;  %v345_v22 = vadd.s32 72, %v1564_v1  ;;  %vm397_vm12 = vcmp.ge.s32.totalorder %v362_v18, %v1570_v4 }
  0x81   : > { %1030 = vmatpush3.msk.msra.mxu0 %vm450_vm15, %v1336_v15  ;;  %1068 = vmatpush3.msk.msra.mxu1 %vm450_vm15, %v1336_v15  ;;  %vm465_vm2 = vmand %vm400_vm10, %vm433_vm11  ;;  %vm415_vm10 = vcmp.lt.s32.totalorder %v347_v17, %v1577_v8  ;;  %v360_v23 = vadd.s32 192, %v1564_v1  ;;  %vm381_vm15 = vcmp.ge.s32.totalorder %v346_v19, %v1570_v4  ;;  %v344_v24 = vadd.s32 64, %v1564_v1 }
  0x82   : > { %1031 = vmatprep.subr.msk.mxu0 %vm465_vm2, %v1336_v15  ;;  %1069 = vmatprep.subr.msk.mxu1 %vm465_vm2, %v1336_v15  ;;  %vm449_vm5 = vmand %vm384_vm13, %vm417_vm14  ;;  %vm430_vm13 = vcmp.lt.s32.totalorder %v362_v18, %v1577_v8  ;;  %vm396_vm2 = vcmp.ge.s32.totalorder %v361_v20, %v1570_v4  ;;  %v359_v25 = vadd.s32 184, %v1564_v1  ;;  %v343_v27 = vadd.s32 56, %v1564_v1 }
  0x83   : > { %1032 = vmatpush3.msk.msra.mxu0 %vm449_vm5, %v1336_v15  ;;  %1070 = vmatpush3.msk.msra.mxu1 %vm449_vm5, %v1336_v15  ;;  %vm464_vm8 = vmand %vm399_vm0, %vm432_vm1  ;;  %vm414_vm0 = vcmp.lt.s32.totalorder %v346_v19, %v1577_v8  ;;  %vm380_vm5 = vcmp.ge.s32.totalorder %v345_v22, %v1570_v4  ;;  %v358_v28 = vadd.s32 176, %v1564_v1  ;;  %v342_v29 = vadd.s32 48, %v1564_v1  ;;  %v321_v19 = vld [vmem:[%s316_s22] sm:$0xff] }
  0x84   : > { %1033 = vmatprep.subr.msk.mxu0 %vm464_vm8, %v1336_v15  ;;  %1071 = vmatprep.subr.msk.mxu1 %vm464_vm8, %v1336_v15  ;;  %vm448_vm11 = vmand %vm383_vm3, %vm416_vm4  ;;  %vm429_vm3 = vcmp.lt.s32.totalorder %v361_v20, %v1577_v8  ;;  %vm395_vm8 = vcmp.ge.s32.totalorder %v360_v23, %v1570_v4  ;;  %v357_v30 = vadd.s32 168, %v1564_v1  ;;  %v341_v31 = vadd.s32 40, %v1564_v1 }
  0x85   : > { %1034 = vmatpush3.msk.msra.mxu0 %vm448_vm11, %v1336_v15  ;;  %1072 = vmatpush3.msk.msra.mxu1 %vm448_vm11, %v1336_v15  ;;  %vm463_vm14 = vmand %vm398_vm6, %vm431_vm7  ;;  %vm413_vm6 = vcmp.lt.s32.totalorder %v345_v22, %v1577_v8  ;;  %vm379_vm11 = vcmp.ge.s32.totalorder %v344_v24, %v1570_v4  ;;  %v356_v32 = vadd.s32 160, %v1564_v1  ;;  %v340_v33 = vadd.s32 32, %v1564_v1 }
  0x86   : > { %1035 = vmatprep.subr.msk.mxu0 %vm463_vm14, %v1336_v15  ;;  %vm447_vm1 = vmand %vm382_vm9, %vm415_vm10  ;;  %1073 = vmatprep.subr.msk.mxu1 %vm463_vm14, %v1336_v15  ;;  %vm428_vm9 = vcmp.lt.s32.totalorder %v360_v23, %v1577_v8  ;;  %vm394_vm14 = vcmp.ge.s32.totalorder %v359_v25, %v1570_v4  ;;  %v355_v34 = vadd.s32 152, %v1564_v1  ;;  %v339_v35 = vadd.s32 24, %v1564_v1 }
  0x87   : > { %1036 = vmatpush3.msk.msra.mxu0 %vm447_vm1, %v1336_v15  ;;  %vm462_vm4 = vmand %vm397_vm12, %vm430_vm13  ;;  %1074 = vmatpush3.msk.msra.mxu1 %vm447_vm1, %v1336_v15  ;;  %vm412_vm12 = vcmp.lt.s32.totalorder %v344_v24, %v1577_v8  ;;  %vm378_vm1 = vcmp.ge.s32.totalorder %v343_v27, %v1570_v4  ;;  %v354_v36 = vadd.s32 144, %v1564_v1  ;;  %v338_v37 = vadd.s32 16, %v1564_v1 }
  0x88   : > { %1037 = vmatprep.subr.msk.mxu0 %vm462_vm4, %v1336_v15  ;;  %vm446_vm7 = vmand %vm381_vm15, %vm414_vm0  ;;  %1075 = vmatprep.subr.msk.mxu1 %vm462_vm4, %v1336_v15  ;;  %vm427_vm15 = vcmp.lt.s32.totalorder %v359_v25, %v1577_v8  ;;  %vm393_vm4 = vcmp.ge.s32.totalorder %v358_v28, %v1570_v4  ;;  %v353_v38 = vadd.s32 136, %v1564_v1  ;;  %v337_v39 = vadd.s32 8, %v1564_v1 }
  0x89   : > { %1038 = vmatpush3.msk.msra.mxu0 %vm446_vm7, %v1336_v15  ;;  %vm461_vm10 = vmand %vm396_vm2, %vm429_vm3  ;;  %1076 = vmatpush3.msk.msra.mxu1 %vm446_vm7, %v1336_v15  ;;  %vm411_vm2 = vcmp.lt.s32.totalorder %v343_v27, %v1577_v8  ;;  %vm377_vm7 = vcmp.ge.s32.totalorder %v342_v29, %v1570_v4  ;;  %v352_v40 = vadd.s32 128, %v1564_v1  ;;  %v613_v48 = vmul.f32 %v332_v42, %v1650_v21  ;;  %v322_v27 = vld [vmem:[%s316_s22 + $0x8] sm:$0xff] }
  0x8a   : > { %vm445_vm13 = vmand %vm380_vm5, %vm413_vm6  ;;  %1039 = vmatprep.subr.msk.mxu0 %vm461_vm10, %v1336_v15  ;;  %1077 = vmatprep.subr.msk.mxu1 %vm461_vm10, %v1336_v15  ;;  %vm426_vm5 = vcmp.lt.s32.totalorder %v358_v28, %v1577_v8  ;;  %vm392_vm10 = vcmp.ge.s32.totalorder %v357_v30, %v1570_v4  ;;  %v612_v50 = vmul.f32 %v331_v44, %v1582_v10  ;;  %v596_v9 = vand.u32 2147483647, %v1582_v10 }
  0x8b   : > { %vm460_vm0 = vmand %vm395_vm8, %vm428_vm9  ;;  %1040 = vmatpush3.msk.msra.mxu0 %vm445_vm13, %v1336_v15  ;;  %1078 = vmatpush3.msk.msra.mxu1 %vm445_vm13, %v1336_v15  ;;  %vm410_vm8 = vcmp.lt.s32.totalorder %v342_v29, %v1577_v8  ;;  %vm376_vm13 = vcmp.ge.s32.totalorder %v341_v31, %v1570_v4  ;;  %v615_v52 = vmul.f32 %v334_v47, %v1690_v26  ;;  %v597_v11 = vand.u32 2147483647, %v1650_v21 }
  0x8c   : > { %vm444_vm3 = vmand %vm379_vm11, %vm412_vm12  ;;  %1041 = vmatprep.subr.msk.mxu0 %vm460_vm0, %v1336_v15  ;;  %1079 = vmatprep.subr.msk.mxu1 %vm460_vm0, %v1336_v15  ;;  %vm425_vm11 = vcmp.lt.s32.totalorder %v357_v30, %v1577_v8  ;;  %vm391_vm0 = vcmp.ge.s32.totalorder %v356_v32, %v1570_v4  ;;  %v502_v55 = vmul.f32 %v1587_v13, %v325_v53  ;;  %v598_v12 = vand.u32 2147483647, %v1587_v13 }
  0x8d   : > { %vm459_vm6 = vmand %vm394_vm14, %vm427_vm15  ;;  %1042 = vmatpush3.msk.msra.mxu0 %vm444_vm3, %v1336_v15  ;;  %1080 = vmatpush3.msk.msra.mxu1 %vm444_vm3, %v1336_v15  ;;  %vm409_vm14 = vcmp.lt.s32.totalorder %v341_v31, %v1577_v8  ;;  %vm375_vm3 = vcmp.ge.s32.totalorder %v340_v33, %v1570_v4  ;;  %v614_v56 = vmul.f32 %v333_v54, %v1587_v13 }
  0x8e   : > { %vm443_vm9 = vmand %vm378_vm1, %vm411_vm2  ;;  %1043 = vmatprep.subr.msk.mxu0 %vm459_vm6, %v1336_v15  ;;  %1081 = vmatprep.subr.msk.mxu1 %vm459_vm6, %v1336_v15  ;;  %vm424_vm1 = vcmp.lt.s32.totalorder %v356_v32, %v1577_v8  ;;  %vm390_vm6 = vcmp.ge.s32.totalorder %v355_v34, %v1570_v4  ;;  %v600_v14 = vadd.f32 %v597_v11, %v596_v9 }
  0x8f   : > { %vm458_vm12 = vmand %vm393_vm4, %vm426_vm5  ;;  %1044 = vmatpush3.msk.msra.mxu0 %vm443_vm9, %v1336_v15  ;;  %1082 = vmatpush3.msk.msra.mxu1 %vm443_vm9, %v1336_v15  ;;  %vm408_vm4 = vcmp.lt.s32.totalorder %v340_v33, %v1577_v8  ;;  %vm374_vm9 = vcmp.ge.s32.totalorder %v339_v35, %v1570_v4 }
  0x90   : > { %vm442_vm15 = vmand %vm377_vm7, %vm410_vm8  ;;  %1045 = vmatprep.subr.msk.mxu0 %vm458_vm12, %v1336_v15  ;;  %1083 = vmatprep.subr.msk.mxu1 %vm458_vm12, %v1336_v15  ;;  %vm423_vm7 = vcmp.lt.s32.totalorder %v355_v34, %v1577_v8  ;;  %vm389_vm12 = vcmp.ge.s32.totalorder %v354_v36, %v1570_v4  ;;  %v601_v16 = vadd.f32 %v600_v14, %v598_v12 }
  0x91   : > { %vm457_vm2 = vmand %vm392_vm10, %vm425_vm11  ;;  %1046 = vmatpush3.msk.msra.mxu0 %vm442_vm15, %v1336_v15  ;;  %1084 = vmatpush3.msk.msra.mxu1 %vm442_vm15, %v1336_v15  ;;  %vm407_vm10 = vcmp.lt.s32.totalorder %v339_v35, %v1577_v8  ;;  %vm373_vm15 = vcmp.ge.s32.totalorder %v338_v37, %v1570_v4 }
  0x92   : > { %vm441_vm5 = vmand %vm376_vm13, %vm409_vm14  ;;  %1047 = vmatprep.subr.msk.mxu0 %vm457_vm2, %v1336_v15  ;;  %1085 = vmatprep.subr.msk.mxu1 %vm457_vm2, %v1336_v15  ;;  %vm422_vm13 = vcmp.lt.s32.totalorder %v354_v36, %v1577_v8  ;;  %vm388_vm2 = vcmp.ge.s32.totalorder %v353_v38, %v1570_v4 }
  0x93   : > { %vm456_vm8 = vmand %vm391_vm0, %vm424_vm1  ;;  %1048 = vmatpush3.msk.msra.mxu0 %vm441_vm5, %v1336_v15  ;;  %1086 = vmatpush3.msk.msra.mxu1 %vm441_vm5, %v1336_v15  ;;  %vm406_vm0 = vcmp.lt.s32.totalorder %v338_v37, %v1577_v8  ;;  %vm372_vm5 = vcmp.ge.s32.totalorder %v337_v39, %v1570_v4 }
  0x94   : > { %vm440_vm11 = vmand %vm375_vm3, %vm408_vm4  ;;  %1049 = vmatprep.subr.msk.mxu0 %vm456_vm8, %v1336_v15  ;;  %1087 = vmatprep.subr.msk.mxu1 %vm456_vm8, %v1336_v15  ;;  %vm421_vm3 = vcmp.lt.s32.totalorder %v353_v38, %v1577_v8  ;;  %vm387_vm8 = vcmp.ge.s32.totalorder %v352_v40, %v1570_v4 }
  0x95   : > { %vm455_vm14 = vmand %vm390_vm6, %vm423_vm7  ;;  %1050 = vmatpush3.msk.msra.mxu0 %vm440_vm11, %v1336_v15  ;;  %1088 = vmatpush3.msk.msra.mxu1 %vm440_vm11, %v1336_v15  ;;  %vm405_vm6 = vcmp.lt.s32.totalorder %v337_v39, %v1577_v8  ;;  %vm371_vm11 = vcmp.ge.s32.totalorder %v1564_v1, %v1570_v4 }
  0x96   : > { %vm439_vm1 = vmand %vm374_vm9, %vm407_vm10  ;;  %1051 = vmatprep.subr.msk.mxu0 %vm455_vm14, %v1336_v15  ;;  %1089 = vmatprep.subr.msk.mxu1 %vm455_vm14, %v1336_v15  ;;  %vm420_vm9 = vcmp.lt.s32.totalorder %v352_v40, %v1577_v8 }
  0x97   : > { %vm454_vm4 = vmand %vm389_vm12, %vm422_vm13  ;;  %1052 = vmatpush3.msk.msra.mxu0 %vm439_vm1, %v1336_v15  ;;  %1090 = vmatpush3.msk.msra.mxu1 %vm439_vm1, %v1336_v15  ;;  %vm404_vm12 = vcmp.lt.s32.totalorder %v1564_v1, %v1577_v8  ;;  %vm748_vm1 = vcmask 916480  }
  0x98   : > { %vm438_vm7 = vmand %vm373_vm15, %vm406_vm0  ;;  %1053 = vmatprep.subr.msk.mxu0 %vm454_vm4, %v1336_v15  ;;  %1091 = vmatprep.subr.msk.mxu1 %vm454_vm4, %v1336_v15  ;;  %vm583_vm0 = vcmask 130048   ;;  %vm775_vm4 = vcmp.eq.s32.totalorder %v1566_v2, 1 }
  0x99   : > { %vm453_vm10 = vmand %vm388_vm2, %vm421_vm3  ;;  %1054 = vmatpush3.msk.msra.mxu0 %vm438_vm7, %v1336_v15  ;;  %1092 = vmatpush3.msk.msra.mxu1 %vm438_vm7, %v1336_v15  ;;  %vm769_vm2 = vcmp.eq.s32.totalorder %v1564_v1, 0  ;;  %vm770_vm3 = vcmp.eq.s32.totalorder %v1566_v2, 0  ;;  %vm780_vm7 = vcmp.eq.s32.totalorder %v1566_v2, 2 }
  0x9a   : > { %vm437_vm13 = vmand %vm372_vm5, %vm405_vm6  ;;  %1055 = vmatprep.subr.msk.mxu0 %vm453_vm10, %v1336_v15  ;;  %1093 = vmatprep.subr.msk.mxu1 %vm453_vm10, %v1336_v15 }
  0x9b   : > { %vm452_vm14 = vmand %vm387_vm8, %vm420_vm9  ;;  %1056 = vmatpush3.msk.msra.mxu0 %vm437_vm13, %v1336_v15  ;;  %1094 = vmatpush3.msk.msra.mxu1 %vm437_vm13, %v1336_v15  ;;  %vm785_vm8 = vcmp.eq.s32.totalorder %v1566_v2, 3 }
  0x9c   : > { %vm436_vm15 = vmand %vm371_vm11, %vm404_vm12  ;;  %1057 = vmatprep.subr.msk.mxu0 %vm452_vm14, %v1336_v15  ;;  %1095 = vmatprep.subr.msk.mxu1 %vm452_vm14, %v1336_v15 }
  0x9d   : > { %1058 = vmatpush3.msk.msra.mxu0 %vm436_vm15, %v1336_v15  ;;  %1096 = vmatpush3.msk.msra.mxu1 %vm436_vm15, %v1336_v15  ;;  %v599_v15 = vand.u32 2147483647, %v1690_v26  ;;  %vm771_vm5 = vmand %vm769_vm2, %vm770_vm3 }
  0x9e   : > { %680 = vmatprep.mubr.f32.mxu1 %v613_v48  ;;  %569 = vmatmul.mubr.f32.vlgmr.msra.gmra.mxu0 %v500_v49  ;;  %vm776_vm6 = vmand %vm769_vm2, %vm775_vm4 }
  0x9f   : > { %681 = vmatmul.mubr.f32.vlgmr.msra.gmra.mxu1 %v612_v50  ;;  %573 = vmatprep.mubr.f32.mxu0 %v503_v51  ;;  %v602_v17 = vadd.f32 %v601_v16, %v599_v15  ;;  %vm781_vm9 = vmand %vm769_vm2, %vm780_vm7 }
  0xa0   : > { %685 = vmatprep.mubr.f32.mxu1 %v615_v52  ;;  %vm786_vm10 = vmand %vm769_vm2, %vm785_vm8 }
  0xa2   : > { %574 = vmatmul.mubr.f32.gmra.mxu0 %v502_v55 }
  0xa3   : > { %686 = vmatmul.mubr.f32.gmra.mxu1 %v614_v56 }
  0xe7   : > { %v715_v57 = vpop.permute.xlu0 %714  ;;  %v719_v59 = vpop.permute.xlu1 %718 }
  0xe8   : > { %v728_v58 = vsub.f32 %v1582_v10, %v715_v57  ;;  %v730_v60 = vsub.f32 %v1587_v13, %v719_v59 }
  0xea   : > { %v732_v61 = vmul.f32 %v728_v58, %v728_v58  ;;  %v734_v62 = vmul.f32 %v730_v60, %v730_v60 }
  0xeb   : > { %v717_v63 = vpop.permute.xlu0 %716  ;;  %v721_v5 = vpop.permute.xlu1 %720 }
  0xec   : > { %740 = vrot.lane.b32.xlu0 %v732_v61, %s1337_s20  ;;  %v722_v0 = vsel %vm583_vm0, %v715_v57, %v717_v63  ;;  %v723_v6 = vsel %vm583_vm0, %v719_v59, %v721_v5 }
  0xed   : > { %v729_v3 = vsub.f32 %v1650_v21, %v722_v0  ;;  %v731_v7 = vsub.f32 %v1690_v26, %v723_v6 }
  0xef   : > { %v733_v4 = vmul.f32 %v729_v3, %v729_v3  ;;  %v735_v8 = vmul.f32 %v731_v7, %v731_v7 }
  0xf0   : > { %744 = vrot.lane.b32.xlu0 %v734_v62, %s1337_s20 }
  0xf1   : > { %742 = vrot.lane.b32.xlu1 %v733_v4, %s1337_s20 }
  0xf5   : > { %746 = vrot.lane.b32.xlu1 %v735_v8, %s1337_s20  ;;  %s1260_s20 = scalar_lea.vmem %s806_s12, 128 }
  0xf6   : > { %p1261_p7 = scmp.ne.s32.totalorder %s806_s12, %s1260_s20  ;;  %p1268_p11 = scmp.lt.s32.totalorder %s1266_s7, %s1260_s20 }
  0xf8   : > { %p1262_p9 = pnand %p1261_p7, %p1981_p8  ;;  %p1269_p6 = por %p1268_p11, %p1267_p2 }
  0xfa   : > { %p1263_p0 = pneg %p1262_p9 }
  0xfc   : > { %p1270_p13 = pnand %p1269_p6, %p1263_p0 }
 0x119   : > { %603 = vadd.xlane.f32.xlu1 %v602_v17 }
 0x15e   : > { %v1059_v18 = vpop.f32.mrf.mxu0  ;;  %v741_v42 = vpop.permute.xlu0 %740 }
 0x15f   : > { %v1097_v10 = vpop.f32.mrf.mxu1 }
 0x160   : > { %v1060_v20 = vpop.f32.mrf.mxu0 }
 0x161   : > { %v1098_v21 = vpop.f32.mrf.mxu1  ;;  %v1061_v13 = vadd.f32 %v1060_v20, %v1059_v18 }
 0x162   : > { %v1099_v22 = vadd.f32 %v1098_v21, %v1097_v10  ;;  %v1062_v23 = vpop.f32.mrf.mxu0  ;;  %v745_v46 = vpop.permute.xlu0 %744 }
 0x163   : > { %v1100_v24 = vpop.f32.mrf.mxu1  ;;  %v579_v25 = vsub.f32 %v321_v19, %v1061_v13  ;;  %v743_v41 = vpop.permute.xlu1 %742 }
 0x164   : > { %v691_v26 = vand.u32 2147483647, %v1099_v22  ;;  %v1063_v28 = vpop.f32.mrf.mxu0  ;;  %v755_v43 = vsel %vm748_vm1, %v743_v41, 0.0  ;;  %v749_v44 = vsel %vm748_vm1, %v741_v42, %v743_v41 }
 0x165   : > { %v1101_v29 = vpop.f32.mrf.mxu1  ;;  %v581_v30 = vmul.f32 %v579_v25, %v579_v25  ;;  %v1064_v32 = vadd.f32 %v1063_v28, %v1062_v23  ;;  %v756_v48 = vadd.f32 %v755_v43, %v749_v44 }
 0x166   : > { %v693_v31 = vmul.f32 1.442695, %v691_v26  ;;  %v1102_v33 = vadd.f32 %v1101_v29, %v1100_v24 }
 0x167   : > { %v580_v34 = vsub.f32 %v322_v27, %v1064_v32  ;;  %v584_v38 = vsel %vm583_vm0, %v581_v30, 0.0  ;;  %v747_v45 = vpop.permute.xlu1 %746 }
 0x168   : > { %v692_v35 = vand.u32 2147483647, %v1102_v33  ;;  %1172 = vpow2.f32 %v693_v31  ;;  %v750_v49 = vsel %vm748_vm1, %v745_v46, %v747_v45  ;;  %v758_v55 = vsel %vm748_vm1, %v747_v45, 0.0 }
 0x169   : > { %v582_v36 = vmul.f32 %v580_v34, %v580_v34  ;;  %v757_v53 = vadd.f32 %v756_v48, %v750_v49 }
 0x16a   : > { %v695_v37 = vmul.f32 1.442695, %v692_v35 }
 0x16b   : > { %v585_v39 = vsel %vm583_vm0, %v582_v36, 0.0  ;;  %v759_v56 = vadd.f32 %v758_v55, %v757_v53 }
 0x16c   : > { %1174 = vpow2.f32 %v695_v37  ;;  %v586_v40 = vadd.f32 %v585_v39, %v584_v38 }
 0x16e   : > { %587 = vadd.xlane.f32.xlu0 %v586_v40 }
 0x175   : > { %v1173_v47 = vpop.eup %1172 }
 0x176   : > { %v697_v51 = vsel %vm583_vm0, %v1173_v47, 0.0 }
 0x179   : > { %v1175_v50 = vpop.eup %1174 }
 0x17a   : > { %v698_v52 = vsel %vm583_vm0, %v1175_v50, 0.0 }
 0x17b   : > { %v699_v54 = vadd.f32 %v698_v52, %v697_v51 }
 0x17d   : > { %700 = vadd.xlane.f32.xlu0 %v699_v54 }
 0x181   : > { %760 = vadd.xlane.f32.xlu0 %v759_v56 }
 0x1a2   : > { %v604_v57 = vpop.xlane.xlu1 %603 }
 0x1a3   : > { %v605_v58 = vrot.slane %v604_v57, 4 }
 0x1a5   : > { %v606_v59 = vadd.f32 %v605_v58, %v604_v57 }
 0x1a7   : > { %v607_v60 = vrot.slane %v606_v59, 2 }
 0x1a9   : > { %v608_v63 = vadd.f32 %v607_v60, %v606_v59 }
 0x1ab   : > { %v609_v4 = vrot.slane %v608_v63, 1 }
 0x1ad   : > { %v610_v7 = vadd.f32 %v609_v4, %v608_v63 }
 0x1f7   : > { %v588_v61 = vpop.xlane.xlu0 %587 }
 0x1f8   : > { %v589_v62 = vrot.slane %v588_v61, 4 }
 0x1fa   : > { %v590_v0 = vadd.f32 %v589_v62, %v588_v61 }
 0x1fc   : > { %v591_v3 = vrot.slane %v590_v0, 2 }
 0x1fe   : > { %v592_v5 = vadd.f32 %v591_v3, %v590_v0 }
 0x200   : > { %v593_v6 = vrot.slane %v592_v5, 1 }
 0x202   : > { %v594_v8 = vadd.f32 %v593_v6, %v592_v5 }
 0x204   : > { %1103 = vpush %v594_v8 }
 0x205   : > { %1105 = vpush %v610_v7 }
 0x206   : > { %v701_v9 = vpop.xlane.xlu0 %700 }
 0x207   : > { %v702_v11 = vrot.slane %v701_v9, 4 }
 0x209   : > { %v703_v12 = vadd.f32 %v702_v11, %v701_v9 }
 0x20a   : > { %v761_v14 = vpop.xlane.xlu0 %760 }
 0x20b   : > { %v704_v15 = vrot.slane %v703_v12, 2  ;;  %v762_v16 = vrot.slane %v761_v14, 4 }
 0x20d   : > { %v763_v17 = vadd.f32 %v762_v16, %v761_v14  ;;  %v705_v18 = vadd.f32 %v704_v15, %v703_v12 }
 0x20f   : > { %v764_v10 = vrot.slane %v763_v17, 2  ;;  %v706_v19 = vrot.slane %v705_v18, 1 }
 0x211   : > { %v765_v20 = vadd.f32 %v764_v10, %v763_v17  ;;  %v707_v21 = vadd.f32 %v706_v19, %v705_v18 }
 0x213   : > { %1107 = vpush %v707_v21  ;;  %v766_v13 = vrot.slane %v765_v20, 1 }
 0x215   : > { %v767_v22 = vadd.f32 %v766_v13, %v765_v20 }
 0x217   : > { %1109 = vpush %v767_v22 }
 0x235   : > { %s1104_s9 = spop %1103 }
 0x236   : > { %s1106_s29 = spop %1105  ;;  %v772_v23 = vstv %s1104_s9 }
 0x237   : > { %v777_v24 = vstv %s1106_s29  ;;  %v773_v25 = vsel %vm771_vm5, %v772_v23, 0.0 }
 0x238   : > { %v778_v26 = vsel %vm776_vm6, %v777_v24, 0.0 }
 0x239   : > { %v779_v27 = vadd.f32 %v778_v26, %v773_v25 }
 0x244   : > { %s1108_s23 = spop %1107 }
 0x245   : > { %s1016_s11 = sadd.f32 -256.0, %s1108_s23 }
 0x247   : > { %v782_v28 = vstv %s1016_s11 }
 0x248   : > { %v783_v29 = vsel %vm781_vm9, %v782_v28, 0.0  ;;  %s1110_s14 = spop %1109 }
 0x249   : > { %v784_v30 = vadd.f32 %v783_v29, %v779_v27  ;;  %v787_v31 = vstv %s1110_s14 }
 0x24a   : > { %v788_v32 = vsel %vm786_vm10, %v787_v31, 0.0 }
 0x24b   : > { %v789_v2 = vadd.f32 %v788_v32, %v784_v30 }
 0x24d   : > { %790 = vst [vmem:[%s311_s5] sm:$0xff] %v789_v2 }
 0x24e   : > { %1273 = shalt.err (!%p1270_p13)
}
 0x24f   : > { %s1274_s8 = scalar_lea.hbm %s803_s25, 128  ;;  %s1278_s22 = scalar_lea.hbm %s1958_s4, 384 }
 0x250   : > { %p1275_p3 = scmp.ne.s32.totalorder %s803_s25, %s1274_s8  ;;  %p1279_p1 = scmp.lt.s32.totalorder %s803_s25, %s1958_s4 }
 0x251   : > { %p1280_p5 = scmp.lt.s32.totalorder %s1278_s22, %s1274_s8 }
 0x252   : > { %p1276_p10 = pnand %p1275_p3, %p1981_p8 }
 0x253   : > { %p1281_p12 = por %p1280_p5, %p1279_p1 }
 0x254   : > { %p1277_p4 = pneg %p1276_p10 }
 0x256   : > { %p1282_p7 = pnand %p1281_p12, %p1277_p4 }
 0x258   : > { %1285 = shalt.err (!%p1282_p7)
}
 0x259   : > { %1117 = dma.vmem_to_hbm [thread:$0]  (%p1981_p8), %s806_s12, 128, %s803_s25, %s792_s13  }
 0x25a PF: > { %p1134_p9 = scmp.ge.s32.totalorder %s1328_s18, 2  ;;  %s817_s30 = sand.u32 1, %s1316_s15  }
 0x25b   : > { %p1982_p0 = scmp.ne.s32.totalorder %s1970_s27, 0  ;;  %s818_s23 = scalar_lea.sflag [#allocation4], %s817_s30 }
 0x25d   : > { %p1130_p2 = pnand %p1134_p9, %p1982_p0 }
 0x25f   : > { %p1131_p11 = pneg %p1130_p2 }
 0x261   : > { %1311 = dma.done.wait (%p1131_p11), %s818_s23, 128  }
 0x262   : > { %1313 = vsyncadd (%p1131_p11), %s818_s23, 4294967168  ;;  %s1983_s11 = sld [smem:[#allocation12_spill]]  ;;  %p20_p6 = scmp.ge.s32.totalorder %s1389_s21, 5  }
 0x263   : > { %s1984_s15 = smov %s1320_s16  ;;  %s1985_s16 = smov %s1324_s17 }
 0x264   : > { %s1987_s18 = smov %s1389_s21  ;;  %22 = sbr.rel (!%p20_p6) target bundleno = 10 (0xa), region = 108 }
 0x268   : > { %s1986_s17 = smov %s1983_s11 }
 0x269   :  { %823 = vsyncpa [#allocation3], 1 }
 0x26a   :  { %825 = vsyncpa [#allocation3 + $0x1], 1 }
 0x26b   :  { %826 = vsyncpa [#allocation6], 1 }
 0x26c   :  { %828 = vsyncpa [#allocation6 + $0x1], 1 }
 0x26d   :  { %829 = vsyncpa [#allocation4], 1 }
 0x26e   :  { %831 = vsyncpa [#allocation4 + $0x1], 1 }

</bundles_post_ra>
